<compile_context>
chip_gen: v7x
topology: tpu7x:2x2x1
jax: 0.10.0
libtpu: 0.0.40
codegen_flags: <defaults>
</compile_context>

<pallas_src>
import functools

import jax
import jax.numpy as jnp
from jax.experimental import pallas as pl
from jax.experimental.pallas import tpu as pltpu


def _round_up(x, m):
    return (x + m - 1) // m * m


def _l2_normalize(x, eps=1e-12):
    # F.normalize(p=2, dim=-1): x / max(||x||, eps) == x * rsqrt(max(||x||^2, eps^2)).
    ssq = jnp.sum(x * x, axis=-1, keepdims=True)
    return x * jax.lax.rsqrt(jnp.maximum(ssq, eps * eps))


def _vmem_cap_bytes():
    # ~7/8 of physical per-core VMEM when queryable (112 MiB on v5e/v6e,
    # 56 MiB on v7x); conservative 48 MiB fallback (safe everywhere).
    try:
        info = pltpu.get_tpu_info()
        phys = getattr(info, "vmem_capacity_bytes", None)
        if phys:
            return int(phys) * 7 // 8
    except Exception:
        pass
    return 48 * 1024 * 1024


def _scores_vmem_estimate(tm, dim, c2, mm_bytes):
    f32 = 4
    est = 2 * (2 * tm * dim * f32)            # src + trg blocks, double-buffered
    est += 2 * dim * c2 * mm_bytes            # prototype slab
    est += 2 * tm * c2 * f32                  # output slab, double-buffered
    est += 2 * tm * dim * (f32 + mm_bytes)    # normalized + stacked LHS value
    est += 3 * tm * c2 * f32                  # MXU result + select
    return est


def _loss_vmem_estimate(tu, dim, c2, mm_bytes):
    f32 = 4
    est = 2 * tu * dim * f32                  # unlabeled block, double-buffered
    est += 2 * dim * c2 * mm_bytes            # prototype slab
    est += tu * dim * (f32 + mm_bytes)        # normalized operand
    est += 10 * tu * c2 * f32                 # scores / exp / probs / masks
    return est


def _shrink_rows(rows, est_fn, budget):
    while rows > 8 and est_fn(rows) > budget:
        rows = max(8, _round_up(rows // 2, 8))
    return rows


# --------------------------------------------------------------------------
# Kernel 1: classification scores, one row tile per grid step.
#   LHS  = [src_n ; trg_n]          (2*TM, dim)   (value, no scratch staging)
#   RHS  = [ps_n | pt_n]            (dim, 2*Cp)   (hoisted, normalized in wrapper)
#   out[r, l] = scores[r, l]        if l <  Cp    (src_n @ ps_n)
#             = scores[TM+r, l]     if l >= Cp    (trg_n @ pt_n)
# --------------------------------------------------------------------------
def _scores_kernel(src_ref, trg_ref, slab_ref, out_ref, *, matmul_dtype):
    tm = src_ref.shape[0]
    c2 = slab_ref.shape[1]
    c_half = c2 // 2

    src_n = _l2_normalize(src_ref[...]).astype(matmul_dtype)
    trg_n = _l2_normalize(trg_ref[...]).astype(matmul_dtype)
    lhs = jnp.concatenate([src_n, trg_n], axis=0)           # sublane concat @ tm (mult of 8)

    scores = jnp.dot(lhs, slab_ref[...],
                     preferred_element_type=jnp.float32)    # (2*tm, c2), one MXU call

    lane = jax.lax.broadcasted_iota(jnp.int32, (tm, c2), 1)
    # Lane-mask select instead of slice+concat: keeps the store lane-dense.
    out_ref[...] = jnp.where(lane < c_half, scores[:tm, :], scores[tm:, :])


# --------------------------------------------------------------------------
# Kernel 2: symmetric-KL consistency loss, tiled over unlabeled row blocks.
# Accumulates into the resident (1,1) output block; divides by nu at the end.
# --------------------------------------------------------------------------
def _loss_kernel(un_ref, slab_ref, loss_ref, *, true_nu, num_class, matmul_dtype):
    i = pl.program_id(0)
    tu = un_ref.shape[0]
    c2 = slab_ref.shape[1]
    c_half = c2 // 2

    @pl.when(i == 0)
    def _():
        loss_ref[...] = jnp.zeros_like(loss_ref)

    un_n = _l2_normalize(un_ref[...]).astype(matmul_dtype)          # (tu, dim)
    scores = jnp.dot(un_n, slab_ref[...],
                     preferred_element_type=jnp.float32)            # (tu, c2)
    s_src = scores[:, :c_half]
    s_trg = scores[:, c_half:]

    if num_class != c_half:
        # Mask zero-padded classes out of the softmax (static branch).
        col = jax.lax.broadcasted_iota(jnp.int32, (tu, c_half), 1)
        neg = jnp.float32(-1e30)
        s_src = jnp.where(col < num_class, s_src, neg)
        s_trg = jnp.where(col < num_class, s_trg, neg)

    def log_softmax_and_probs(x):
        m = jnp.max(x, axis=-1, keepdims=True)
        z = x - m
        e = jnp.exp(z)                      # reused: no second exp for the probs
        s = jnp.sum(e, axis=-1, keepdims=True)
        return z - jnp.log(s), e / s

    ls_s, p_s = log_softmax_and_probs(s_src)
    ls_t, p_t = log_softmax_and_probs(s_trg)
    # Fused symmetric KL: 0.5*(sum p_t*(ls_t-ls_s) + sum p_s*(ls_s-ls_t))
    #                   = 0.5*sum((p_t - p_s)*(ls_t - ls_s))
    contrib = (p_t - p_s) * (ls_t - ls_s)

    # Mask rows beyond the true row count (partial last tile, no padding copies).
    row = jax.lax.broadcasted_iota(jnp.int32, (tu, c_half), 0) + i * tu
    contrib = jnp.where(row < true_nu, contrib, jnp.float32(0.0))

    loss_ref[...] += 0.5 * jnp.sum(contrib, keepdims=True)

    @pl.when(i == pl.num_programs(0) - 1)
    def _():
        loss_ref[...] = loss_ref[...] / jnp.float32(true_nu)


# --------------------------------------------------------------------------
# Wrapper
# --------------------------------------------------------------------------
@functools.partial(jax.jit, static_argnames=("block_rows", "matmul_dtype"))
def tpn_task_loss(src_feat, trg_feat, trg_feat_un, proto_s, proto_t,
                  block_rows=512, matmul_dtype=jnp.float32):
    nf, dim = src_feat.shape
    nu = trg_feat_un.shape[0]
    num_class = proto_s.shape[1]
    f32 = jnp.float32
    mm_bytes = jnp.dtype(matmul_dtype).itemsize

    # ---- hoisted, lane-dense normalized prototype slab [ps_n | pt_n] ----
    c_half = _round_up(num_class, 64)          # 2*c_half is a multiple of 128
    ps_n = _l2_normalize(proto_s.astype(f32))
    pt_n = _l2_normalize(proto_t.astype(f32))
    if c_half != num_class:
        pad = ((0, 0), (0, c_half - num_class))
        ps_n = jnp.pad(ps_n, pad)
        pt_n = jnp.pad(pt_n, pad)
    slab = jnp.concatenate([ps_n, pt_n], axis=-1).astype(matmul_dtype)   # (dim, 2*c_half)
    c2 = 2 * c_half

    cap = _vmem_cap_bytes()
    budget = max(16 * 1024 * 1024, cap - 4 * 1024 * 1024)   # internal-scratch headroom

    # ---- kernel 1: classification scores (parallel row tiles, no padding copies) ----
    tm = min(_round_up(block_rows, 8), _round_up(nf, 8))
    tm = _shrink_rows(tm, lambda t: _scores_vmem_estimate(t, dim, c2, mm_bytes), budget)
    if pl.cdiv(nf, tm) == 1 and nf > 8:
        # Give the ("parallel",) grid at least two tiles (v7x has 2 TensorCores).
        tm = max(8, _round_up(pl.cdiv(nf, 2), 8))
    n_tiles = pl.cdiv(nf, tm)

    scores = pl.pallas_call(
        functools.partial(_scores_kernel, matmul_dtype=matmul_dtype),
        out_shape=jax.ShapeDtypeStruct((nf, c2), f32),
        grid=(n_tiles,),
        in_specs=[
            pl.BlockSpec((tm, dim), lambda i: (i, 0)),
            pl.BlockSpec((tm, dim), lambda i: (i, 0)),
            pl.BlockSpec((dim, c2), lambda i: (0, 0)),
        ],
        out_specs=pl.BlockSpec((tm, c2), lambda i: (i, 0)),
        compiler_params=pltpu.CompilerParams(
            dimension_semantics=("parallel",),
            vmem_limit_bytes=cap),
    )(src_feat, trg_feat, slab)

    # ---- kernel 2: tiled, pipelined symmetric-KL loss over unlabeled rows ----
    tu = min(_round_up(block_rows, 8), _round_up(nu, 8))
    tu = _shrink_rows(tu, lambda t: _loss_vmem_estimate(t, dim, c2, mm_bytes), budget)
    nu_tiles = pl.cdiv(nu, tu)

    loss = pl.pallas_call(
        functools.partial(_loss_kernel, true_nu=nu, num_class=num_class,
                          matmul_dtype=matmul_dtype),
        out_shape=jax.ShapeDtypeStruct((1, 1), f32),
        grid=(nu_tiles,),
        in_specs=[
            pl.BlockSpec((tu, dim), lambda i: (i, 0)),
            pl.BlockSpec((dim, c2), lambda i: (0, 0)),
        ],
        out_specs=pl.BlockSpec((1, 1), lambda i: (0, 0)),
        compiler_params=pltpu.CompilerParams(
            dimension_semantics=("arbitrary",),
            vmem_limit_bytes=cap),
    )(trg_feat_un, slab)

    cls_src = scores[:, :num_class]
    cls_trg = scores[:, c_half:c_half + num_class]
    return cls_src, cls_trg, loss[0, 0]


# --------------------------------------------------------------------------
# Pure-JAX reference mirroring forward_standard (independent formulation).
# --------------------------------------------------------------------------
def _reference(src_feat, trg_feat, trg_feat_un, proto_s, proto_t):
    def norm(x, eps=1e-12):
        n = jnp.sqrt(jnp.sum(x * x, axis=-1, keepdims=True))
        return x / jnp.maximum(n, eps)

    nf = src_feat.shape[0]
    un_src = jnp.concatenate([src_feat, trg_feat_un], axis=0)
    un_trg = jnp.concatenate([trg_feat, trg_feat_un], axis=0)
    s_score = norm(un_src) @ norm(proto_s)
    t_score = norm(un_trg) @ norm(proto_t)
    cls_src, un_s = s_score[:nf], s_score[nf:]
    cls_trg, un_t = t_score[:nf], t_score[nf:]
    ls_s = jax.nn.log_softmax(un_s, axis=-1)
    ls_t = jax.nn.log_softmax(un_t, axis=-1)
    p_s, p_t = jnp.exp(ls_s), jnp.exp(ls_t)
    kl1 = jnp.sum(p_t * (ls_t - ls_s))   # kl_div(log_softmax(src), softmax(trg)), sum
    kl2 = jnp.sum(p_s * (ls_s - ls_t))   # kl_div(log_softmax(trg), softmax(src)), sum
    return cls_src, cls_trg, 0.5 * (kl1 + kl2) / trg_feat_un.shape[0]


if __name__ == "__main__":
    # Shapes consistent with the module (num_class=64 default; small dim for demo).
    nf, nu, dim, num_class = 8, 16, 128, 64

    key = jax.random.PRNGKey(0)
    ks = jax.random.split(key, 10)
    src_feat = jax.random.normal(ks[0], (nf, dim), dtype=jnp.float32)
    trg_feat = jax.random.normal(ks[1], (nf, dim), dtype=jnp.float32)
    trg_feat_un = jax.random.normal(ks[2], (nu, dim), dtype=jnp.float32)
    # Parameters: normal_(0, 0.02), deterministic in-script init.
    proto_s = 0.02 * jax.random.normal(ks[3], (dim, num_class), dtype=jnp.float32)
    proto_t = 0.02 * jax.random.normal(ks[4], (dim, num_class), dtype=jnp.float32)

    out = tpn_task_loss(src_feat, trg_feat, trg_feat_un, proto_s, proto_t)
    jax.block_until_ready(out)
    cls_src, cls_trg, tpn_loss = out
    assert cls_src.shape == (nf, num_class) and cls_trg.shape == (nf, num_class)
    ref = _reference(src_feat, trg_feat, trg_feat_un, proto_s, proto_t)
    for got, want in zip(out, ref):
        assert jnp.allclose(got, want, atol=1e-5, rtol=1e-5)

    # Row counts that are not multiples of 8 / of the tile: exercises partial
    # blocks in kernel 1 and explicit row masking in kernel 2 (no jnp.pad path).
    nf2, nu2 = 12, 20
    src2 = jax.random.normal(ks[5], (nf2, dim), dtype=jnp.float32)
    trg2 = jax.random.normal(ks[6], (nf2, dim), dtype=jnp.float32)
    un2 = jax.random.normal(ks[7], (nu2, dim), dtype=jnp.float32)
    out2 = tpn_task_loss(src2, trg2, un2, proto_s, proto_t)
    jax.block_until_ready(out2)
    ref2 = _reference(src2, trg2, un2, proto_s, proto_t)
    for got, want in zip(out2, ref2):
        assert jnp.allclose(got, want, atol=1e-5, rtol=1e-5)

    # num_class not a multiple of 64: exercises the class-padding + softmax-mask path.
    c3 = 48
    ps3 = 0.02 * jax.random.normal(ks[8], (dim, c3), dtype=jnp.float32)
    pt3 = 0.02 * jax.random.normal(ks[9], (dim, c3), dtype=jnp.float32)
    out3 = tpn_task_loss(src2, trg2, un2, ps3, pt3)
    jax.block_until_ready(out3)
    ref3 = _reference(src2, trg2, un2, ps3, pt3)
    for got, want in zip(out3, ref3):
        assert jnp.allclose(got, want, atol=1e-5, rtol=1e-5)

    print("KERNEL_OK")
</pallas_src>

<mosaic_0001>
module attributes {stable_mosaic.version = 11 : i64} {
  func.func @_scores_kernel(%arg0: i32, %arg1: memref<8x128xf32, #tpu.memory_space<vmem>>, %arg2: memref<8x128xf32, #tpu.memory_space<vmem>>, %arg3: memref<128x128xf32, #tpu.memory_space<vmem>>, %arg4: memref<8x128xf32, #tpu.memory_space<vmem>>) attributes {dimension_semantics = [#tpu.dimension_semantics<parallel>], iteration_bounds = array<i64: 1>, scalar_prefetch = 0 : i64, scratch_operands = 0 : i64, tpu.core_type = #tpu.core_type<tc>, window_params = [{transform_indices = @transform_0, window_bounds = array<i64: 8, 128>}, {transform_indices = @transform_1, window_bounds = array<i64: 8, 128>}, {pipeline_mode = #tpu.pipeline_mode<synchronous>, transform_indices = @transform_2, window_bounds = array<i64: 128, 128>}, {transform_indices = @transform_3, window_bounds = array<i64: 8, 128>}]} {
    %c0 = arith.constant 0 : index
    %c0_0 = arith.constant 0 : index
    %0 = vector.load %arg1[%c0, %c0_0] : memref<8x128xf32, #tpu.memory_space<vmem>>, vector<8x128xf32>
    %1 = arith.mulf %0, %0 : vector<8x128xf32>
    %cst = arith.constant dense<0.000000e+00> : vector<8xf32>
    %2 = vector.multi_reduction <add>, %1, %cst [1] : vector<8x128xf32> to vector<8xf32>
    %3 = vector.shape_cast %2 : vector<8xf32> to vector<8x1xf32>
    %cst_1 = arith.constant 1.000000e-24 : f32
    %4 = vector.broadcast %cst_1 : f32 to vector<8x1xf32>
    %5 = arith.maximumf %3, %4 : vector<8x1xf32>
    %6 = math.rsqrt %5 : vector<8x1xf32>
    %7 = vector.broadcast %6 : vector<8x1xf32> to vector<8x128xf32>
    %8 = arith.mulf %0, %7 : vector<8x128xf32>
    %c0_2 = arith.constant 0 : index
    %c0_3 = arith.constant 0 : index
    %9 = vector.load %arg2[%c0_2, %c0_3] : memref<8x128xf32, #tpu.memory_space<vmem>>, vector<8x128xf32>
    %10 = arith.mulf %9, %9 : vector<8x128xf32>
    %cst_4 = arith.constant dense<0.000000e+00> : vector<8xf32>
    %11 = vector.multi_reduction <add>, %10, %cst_4 [1] : vector<8x128xf32> to vector<8xf32>
    %12 = vector.shape_cast %11 : vector<8xf32> to vector<8x1xf32>
    %cst_5 = arith.constant 1.000000e-24 : f32
    %13 = vector.broadcast %cst_5 : f32 to vector<8x1xf32>
    %14 = arith.maximumf %12, %13 : vector<8x1xf32>
    %15 = math.rsqrt %14 : vector<8x1xf32>
    %16 = vector.broadcast %15 : vector<8x1xf32> to vector<8x128xf32>
    %17 = arith.mulf %9, %16 : vector<8x128xf32>
    %18 = tpu.concatenate %8, %17 in 0 : vector<8x128xf32>, vector<8x128xf32> -> vector<16x128xf32>
    %c0_6 = arith.constant 0 : index
    %c0_7 = arith.constant 0 : index
    %19 = vector.load %arg3[%c0_6, %c0_7] : memref<128x128xf32, #tpu.memory_space<vmem>>, vector<128x128xf32>
    %cst_8 = arith.constant dense<0.000000e+00> : vector<16x128xf32>
    %20 = tpu.matmul %18, %19, %cst_8 {dimension_numbers = #tpu.dot_dimension_numbers<[1], [0], [0], [1], [0, 0, 1, 1], [], []>} : vector<16x128xf32>, vector<128x128xf32>, vector<16x128xf32> -> vector<16x128xf32>
    %21 = tpu.iota {dimensions = array<i32: 1>} : vector<8x128xi32>
    %c64_i32 = arith.constant 64 : i32
    %22 = vector.broadcast %c64_i32 : i32 to vector<8x128xi32>
    %23 = arith.cmpi slt, %21, %22 : vector<8x128xi32>
    %24 = vector.extract_strided_slice %20 {offsets = [0, 0], sizes = [8, 128], strides = [1, 1]} : vector<16x128xf32> to vector<8x128xf32>
    %25 = vector.extract_strided_slice %20 {offsets = [8, 0], sizes = [8, 128], strides = [1, 1]} : vector<16x128xf32> to vector<8x128xf32>
    %26 = arith.select %23, %24, %25 : vector<8x128xi1>, vector<8x128xf32>
    %c0_9 = arith.constant 0 : index
    %c0_10 = arith.constant 0 : index
    %27 = vector.load %arg4[%c0_9, %c0_10] : memref<8x128xf32, #tpu.memory_space<vmem>>, vector<8x128xf32>
    tpu.vector_store %arg4[%c0_9, %c0_10], %26 {strides = array<i32>} : memref<8x128xf32, #tpu.memory_space<vmem>>, vector<8x128xf32>,
    return
  }
  func.func @transform_0(%arg0: i32) -> (i32, i32) {
    %c0_i32 = arith.constant 0 : i32
    %c0_i32_0 = arith.constant 0 : i32
    return %arg0, %c0_i32 : i32, i32
  }
  func.func @transform_1(%arg0: i32) -> (i32, i32) {
    %c0_i32 = arith.constant 0 : i32
    %c0_i32_0 = arith.constant 0 : i32
    return %arg0, %c0_i32 : i32, i32
  }
  func.func @transform_2(%arg0: i32) -> (i32, i32) {
    %c0_i32 = arith.constant 0 : i32
    %c0_i32_0 = arith.constant 0 : i32
    %c0_i32_1 = arith.constant 0 : i32
    return %c0_i32, %c0_i32_0 : i32, i32
  }
  func.func @transform_3(%arg0: i32) -> (i32, i32) {
    %c0_i32 = arith.constant 0 : i32
    %c0_i32_0 = arith.constant 0 : i32
    return %arg0, %c0_i32 : i32, i32
  }
}

module attributes {stable_mosaic.version = 11 : i64} {
  func.func @_loss_kernel(%arg0: i32, %arg1: memref<16x128xf32, #tpu.memory_space<vmem>>, %arg2: memref<128x128xf32, #tpu.memory_space<vmem>>, %arg3: memref<1x1xf32, #tpu.memory_space<vmem>>) attributes {dimension_semantics = [#tpu.dimension_semantics<arbitrary>], iteration_bounds = array<i64: 1>, scalar_prefetch = 0 : i64, scratch_operands = 0 : i64, tpu.core_type = #tpu.core_type<tc>, window_params = [{transform_indices = @transform_0, window_bounds = array<i64: 16, 128>}, {pipeline_mode = #tpu.pipeline_mode<synchronous>, transform_indices = @transform_1, window_bounds = array<i64: 128, 128>}, {pipeline_mode = #tpu.pipeline_mode<synchronous>, transform_indices = @transform_2, window_bounds = array<i64: 1, 1>}]} {
    %c0_i32 = arith.constant 0 : i32
    %0 = arith.cmpi eq, %arg0, %c0_i32 : i32
    %1 = arith.extui %0 : i1 to i32
    %c0_i32_0 = arith.constant 0 : i32
    %2 = arith.cmpi ne, %1, %c0_i32_0 : i32
    scf.if %2 {
      %cst_20 = arith.constant 0.000000e+00 : f32
      %64 = vector.broadcast %cst_20 : f32 to vector<1x1xf32>
      %c0_21 = arith.constant 0 : index
      %c0_22 = arith.constant 0 : index
      %65 = vector.load %arg3[%c0_21, %c0_22] : memref<1x1xf32, #tpu.memory_space<vmem>>, vector<1x1xf32>
      tpu.vector_store %arg3[%c0_21, %c0_22], %64 {strides = array<i32>} : memref<1x1xf32, #tpu.memory_space<vmem>>, vector<1x1xf32>,
    } else {
    }
    %c0 = arith.constant 0 : index
    %c0_1 = arith.constant 0 : index
    %3 = vector.load %arg1[%c0, %c0_1] : memref<16x128xf32, #tpu.memory_space<vmem>>, vector<16x128xf32>
    %4 = arith.mulf %3, %3 : vector<16x128xf32>
    %cst = arith.constant dense<0.000000e+00> : vector<16xf32>
    %5 = vector.multi_reduction <add>, %4, %cst [1] : vector<16x128xf32> to vector<16xf32>
    %6 = vector.shape_cast %5 : vector<16xf32> to vector<16x1xf32>
    %cst_2 = arith.constant 1.000000e-24 : f32
    %7 = vector.broadcast %cst_2 : f32 to vector<16x1xf32>
    %8 = arith.maximumf %6, %7 : vector<16x1xf32>
    %9 = math.rsqrt %8 : vector<16x1xf32>
    %10 = vector.broadcast %9 : vector<16x1xf32> to vector<16x128xf32>
    %11 = arith.mulf %3, %10 : vector<16x128xf32>
    %c0_3 = arith.constant 0 : index
    %c0_4 = arith.constant 0 : index
    %12 = vector.load %arg2[%c0_3, %c0_4] : memref<128x128xf32, #tpu.memory_space<vmem>>, vector<128x128xf32>
    %cst_5 = arith.constant dense<0.000000e+00> : vector<16x128xf32>
    %13 = tpu.matmul %11, %12, %cst_5 {dimension_numbers = #tpu.dot_dimension_numbers<[1], [0], [0], [1], [0, 0, 1, 1], [], []>} : vector<16x128xf32>, vector<128x128xf32>, vector<16x128xf32> -> vector<16x128xf32>
    %14 = vector.extract_strided_slice %13 {offsets = [0, 0], sizes = [16, 64], strides = [1, 1]} : vector<16x128xf32> to vector<16x64xf32>
    %15 = vector.extract_strided_slice %13 {offsets = [0, 64], sizes = [16, 64], strides = [1, 1]} : vector<16x128xf32> to vector<16x64xf32>
    %cst_6 = arith.constant dense<0xFF800000> : vector<16xf32>
    %16 = vector.multi_reduction <maximumf>, %14, %cst_6 [1] : vector<16x64xf32> to vector<16xf32>
    %17 = vector.shape_cast %16 : vector<16xf32> to vector<16x1xf32>
    %18 = vector.broadcast %17 : vector<16x1xf32> to vector<16x64xf32>
    %19 = arith.subf %14, %18 : vector<16x64xf32>
    %20 = math.exp %19 : vector<16x64xf32>
    %cst_7 = arith.constant dense<0.000000e+00> : vector<16xf32>
    %21 = vector.multi_reduction <add>, %20, %cst_7 [1] : vector<16x64xf32> to vector<16xf32>
    %22 = vector.shape_cast %21 : vector<16xf32> to vector<16x1xf32>
    %23 = math.log %22 : vector<16x1xf32>
    %24 = vector.broadcast %23 : vector<16x1xf32> to vector<16x64xf32>
    %25 = arith.subf %19, %24 : vector<16x64xf32>
    %26 = vector.broadcast %22 : vector<16x1xf32> to vector<16x64xf32>
    %27 = arith.divf %20, %26 : vector<16x64xf32>
    %cst_8 = arith.constant dense<0xFF800000> : vector<16xf32>
    %28 = vector.multi_reduction <maximumf>, %15, %cst_8 [1] : vector<16x64xf32> to vector<16xf32>
    %29 = vector.shape_cast %28 : vector<16xf32> to vector<16x1xf32>
    %30 = vector.broadcast %29 : vector<16x1xf32> to vector<16x64xf32>
    %31 = arith.subf %15, %30 : vector<16x64xf32>
    %32 = math.exp %31 : vector<16x64xf32>
    %cst_9 = arith.constant dense<0.000000e+00> : vector<16xf32>
    %33 = vector.multi_reduction <add>, %32, %cst_9 [1] : vector<16x64xf32> to vector<16xf32>
    %34 = vector.shape_cast %33 : vector<16xf32> to vector<16x1xf32>
    %35 = math.log %34 : vector<16x1xf32>
    %36 = vector.broadcast %35 : vector<16x1xf32> to vector<16x64xf32>
    %37 = arith.subf %31, %36 : vector<16x64xf32>
    %38 = vector.broadcast %34 : vector<16x1xf32> to vector<16x64xf32>
    %39 = arith.divf %32, %38 : vector<16x64xf32>
    %40 = arith.subf %39, %27 : vector<16x64xf32>
    %41 = arith.subf %37, %25 : vector<16x64xf32>
    %42 = arith.mulf %40, %41 : vector<16x64xf32>
    %43 = tpu.iota {dimensions = array<i32: 0>} : vector<16x64xi32>
    %c16_i32 = arith.constant 16 : i32
    %44 = arith.muli %arg0, %c16_i32 : i32
    %45 = vector.broadcast %44 : i32 to vector<16x64xi32>
    %46 = arith.addi %43, %45 : vector<16x64xi32>
    %c16_i32_10 = arith.constant 16 : i32
    %47 = vector.broadcast %c16_i32_10 : i32 to vector<16x64xi32>
    %48 = arith.cmpi slt, %46, %47 : vector<16x64xi32>
    %cst_11 = arith.constant 0.000000e+00 : f32
    %49 = vector.broadcast %cst_11 : f32 to vector<16x64xf32>
    %50 = arith.select %48, %42, %49 : vector<16x64xi1>, vector<16x64xf32>
    %c0_12 = arith.constant 0 : index
    %c0_13 = arith.constant 0 : index
    %51 = vector.load %arg3[%c0_12, %c0_13] : memref<1x1xf32, #tpu.memory_space<vmem>>, vector<1x1xf32>
    %52 = vector.shape_cast %50 : vector<16x64xf32> to vector<1x16x64xf32>
    %cst_14 = arith.constant dense<0.000000e+00> : vector<1xf32>
    %53 = vector.multi_reduction <add>, %52, %cst_14 [1, 2] : vector<1x16x64xf32> to vector<1xf32>
    %54 = vector.shape_cast %53 : vector<1xf32> to vector<1x1x1xf32>
    %55 = vector.extract %54[0, 0, 0] : f32 from vector<1x1x1xf32>
    %56 = vector.broadcast %55 : f32 to vector<1x1xf32>
    %cst_15 = arith.constant 5.000000e-01 : f32
    %57 = vector.broadcast %cst_15 : f32 to vector<1x1xf32>
    %58 = arith.mulf %57, %56 : vector<1x1xf32>
    %59 = arith.addf %51, %58 : vector<1x1xf32>
    %c0_16 = arith.constant 0 : index
    %c0_17 = arith.constant 0 : index
    %60 = vector.load %arg3[%c0_16, %c0_17] : memref<1x1xf32, #tpu.memory_space<vmem>>, vector<1x1xf32>
    tpu.vector_store %arg3[%c0_16, %c0_17], %59 {strides = array<i32>} : memref<1x1xf32, #tpu.memory_space<vmem>>, vector<1x1xf32>,
    %c0_i32_18 = arith.constant 0 : i32
    %61 = arith.cmpi eq, %arg0, %c0_i32_18 : i32
    %62 = arith.extui %61 : i1 to i32
    %c0_i32_19 = arith.constant 0 : i32
    %63 = arith.cmpi ne, %62, %c0_i32_19 : i32
    scf.if %63 {
      %c0_20 = arith.constant 0 : index
      %c0_21 = arith.constant 0 : index
      %64 = vector.load %arg3[%c0_20, %c0_21] : memref<1x1xf32, #tpu.memory_space<vmem>>, vector<1x1xf32>
      %cst_22 = arith.constant 1.600000e+01 : f32
      %65 = vector.broadcast %cst_22 : f32 to vector<1x1xf32>
      %66 = arith.divf %64, %65 : vector<1x1xf32>
      %c0_23 = arith.constant 0 : index
      %c0_24 = arith.constant 0 : index
      %67 = vector.load %arg3[%c0_23, %c0_24] : memref<1x1xf32, #tpu.memory_space<vmem>>, vector<1x1xf32>
      tpu.vector_store %arg3[%c0_23, %c0_24], %66 {strides = array<i32>} : memref<1x1xf32, #tpu.memory_space<vmem>>, vector<1x1xf32>,
    } else {
    }
    return
  }
  func.func @transform_0(%arg0: i32) -> (i32, i32) {
    %c0_i32 = arith.constant 0 : i32
    %c0_i32_0 = arith.constant 0 : i32
    return %arg0, %c0_i32 : i32, i32
  }
  func.func @transform_1(%arg0: i32) -> (i32, i32) {
    %c0_i32 = arith.constant 0 : i32
    %c0_i32_0 = arith.constant 0 : i32
    %c0_i32_1 = arith.constant 0 : i32
    return %c0_i32, %c0_i32_0 : i32, i32
  }
  func.func @transform_2(%arg0: i32) -> (i32, i32) {
    %c0_i32 = arith.constant 0 : i32
    %c0_i32_0 = arith.constant 0 : i32
    %c0_i32_1 = arith.constant 0 : i32
    return %c0_i32, %c0_i32_0 : i32, i32
  }
}

</mosaic_0001>

<bundles_post_ra>
// kernel: tpn_task_loss.2
= control target key start
LH: loop header
LB: loop body
LE: loop exit
PB: predicated region body
PF: predicated region fallthrough
CT: control target
= control target key end

     0   :  { %v119_v36 = vlaneseq  ;;  %s294_s0 = inlined_call_operand.vmem [shape: f32[8,128], index: 0, kind: input, shape index: {}]   ;;  %s295_s1 = inlined_call_operand.vmem [shape: f32[8,128], index: 1, kind: input, shape index: {}]   ;;  %s296_s2 = inlined_call_operand.vmem [shape: f32[128,128], index: 2, kind: input, shape index: {}]   ;;  %s297_s3 = inlined_call_operand.vmem [shape: f32[8,128], index: 3, kind: output, shape index: {}]  }
   0x1   :  { %v14_v0 = vld [vmem:[%s294_s0] sm:$0xff]  ;;  %v29_v4 = vld [vmem:[%s296_s2 + $0x8] sm:$0xff]  ;;  %v30_v5 = vld [vmem:[%s296_s2 + $0x10] sm:$0xff] }
   0x2   :  { %v21_v1 = vld [vmem:[%s295_s1] sm:$0xff]  ;;  %v15_v3 = vmul.f32 %v14_v0, %v14_v0  ;;  %v31_v6 = vld [vmem:[%s296_s2 + $0x18] sm:$0xff]  ;;  %v33_v11 = vld [vmem:[%s296_s2 + $0x28] sm:$0xff]  ;;  %v120_v37 = vand.u32 127, %v119_v36 }
   0x3   :  { %v28_v2 = vld [vmem:[%s296_s2] sm:$0xff]  ;;  %v185_v8 = vpack.c.bf16 %v31_v6, %v30_v5  ;;  %v22_v9 = vmul.f32 %v21_v1, %v21_v1  ;;  %v34_v13 = vld [vmem:[%s296_s2 + $0x30] sm:$0xff]  ;;  %v35_v14 = vld [vmem:[%s296_s2 + $0x38] sm:$0xff] }
   0x4   :  { %v181_v7 = vpack.c.bf16 %v29_v4, %v28_v2  ;;  %16 = vadd.xlane.f32.xlu0 %v15_v3  ;;  %v32_v10 = vld [vmem:[%s296_s2 + $0x20] sm:$0xff]  ;;  %v193_v15 = vpack.c.bf16 %v35_v14, %v34_v13  ;;  %v37_v17 = vld [vmem:[%s296_s2 + $0x48] sm:$0xff]  ;;  %v38_v19 = vld [vmem:[%s296_s2 + $0x50] sm:$0xff]  ;;  %vm121_vm0 = vcmp.lt.s32.totalorder %v120_v37, 64 }
   0x5   :  { %v189_v12 = vpack.c.bf16 %v33_v11, %v32_v10  ;;  %v36_v16 = vld [vmem:[%s296_s2 + $0x40] sm:$0xff]  ;;  %v39_v20 = vld [vmem:[%s296_s2 + $0x58] sm:$0xff]  ;;  %v41_v23 = vld [vmem:[%s296_s2 + $0x68] sm:$0xff] }
   0x6   :  { %182 = vmatprep.subr.bf16.mxu0 %v181_v7  ;;  %v197_v18 = vpack.c.bf16 %v37_v17, %v36_v16  ;;  %v201_v21 = vpack.c.bf16 %v39_v20, %v38_v19  ;;  %v40_v22 = vld [vmem:[%s296_s2 + $0x60] sm:$0xff]  ;;  %v42_v24 = vld [vmem:[%s296_s2 + $0x70] sm:$0xff]  ;;  %v43_v26 = vld [vmem:[%s296_s2 + $0x78] sm:$0xff] }
   0x7   :  { %184 = vmatpush3.bf16.msra.mxu0 %v181_v7  ;;  %v205_v25 = vpack.c.bf16 %v41_v23, %v40_v22  ;;  %v209_v27 = vpack.c.bf16 %v43_v26, %v42_v24 }
   0x8   :  { %186 = vmatprep.subr.bf16.mxu0 %v185_v8  ;;  %23 = vadd.xlane.f32.xlu0 %v22_v9 }
   0xb   :  { %188 = vmatpush3.bf16.msra.mxu0 %v185_v8 }
   0xc   :  { %190 = vmatprep.subr.bf16.mxu0 %v189_v12 }
   0xf   :  { %192 = vmatpush3.bf16.msra.mxu0 %v189_v12 }
  0x10   :  { %194 = vmatprep.subr.bf16.mxu0 %v193_v15 }
  0x13   :  { %196 = vmatpush3.bf16.msra.mxu0 %v193_v15 }
  0x14   :  { %198 = vmatprep.subr.bf16.mxu0 %v197_v18 }
  0x17   :  { %200 = vmatpush3.bf16.msra.mxu0 %v197_v18 }
  0x18   :  { %202 = vmatprep.subr.bf16.mxu0 %v201_v21 }
  0x1b   :  { %204 = vmatpush3.bf16.msra.mxu0 %v201_v21 }
  0x1c   :  { %206 = vmatprep.subr.bf16.mxu0 %v205_v25 }
  0x1f   :  { %208 = vmatpush3.bf16.msra.mxu0 %v205_v25 }
  0x20   :  { %210 = vmatprep.subr.bf16.mxu0 %v209_v27 }
  0x23   :  { %212 = vmatpush3.bf16.msra.mxu0 %v209_v27 }
  0x91   :  { %v17_v28 = vpop.xlane.xlu0 %16 }
  0x92   :  { %v18_v29 = vmax.f32 %v17_v28, 1e-24 }
  0x94   :  { %213 = vrsqrt.f32 %v18_v29 }
  0x95   :  { %v24_v30 = vpop.xlane.xlu0 %23 }
  0x96   :  { %v25_v31 = vmax.f32 %v24_v30, 1e-24 }
  0x98   :  { %215 = vrsqrt.f32 %v25_v31 }
  0x9e   :  { %v214_v32 = vpop.eup %213 }
  0x9f   :  { %v20_v33 = vmul.f32 %v214_v32, %v14_v0 }
  0xa1   :  { %178 = vmatprep.mubr.f32.mxu0 %v20_v33 }
  0xa2   :  { %v216_v34 = vpop.eup %215 }
  0xa3   :  { %v27_v35 = vmul.f32 %v216_v34, %v21_v1 }
  0xa5   :  { %179 = vmatmul.mubr.f32.vlgmr.msra.gmra.mrb[0].mxu0 %v27_v35 }
 0x178   :  { %v180_v38 = vpop.f32.mrb[0].mxu0 }
 0x179   :  { %v110_v39 = vpop.f32.mrb[1].mxu0 }
 0x17a   :  { %v122_v40 = vsel %vm121_vm0, %v110_v39, %v180_v38 }
 0x17b   :  { %123 = vst [vmem:[%s297_s3] sm:$0xff] %v122_v40 }

// kernel: tpn_task_loss.3
= control target key start
LH: loop header
LB: loop body
LE: loop exit
PB: predicated region body
PF: predicated region fallthrough
CT: control target
= control target key end

     0   :  { %s522_s0 = inlined_call_operand.vmem [shape: f32[16,128], index: 0, kind: input, shape index: {}]   ;;  %s523_s1 = inlined_call_operand.vmem [shape: f32[128,128], index: 1, kind: input, shape index: {}]   ;;  %s524_s2 = inlined_call_operand.hbm [shape: f32[1,1], index: 2, kind: output, shape index: {}]  }
   0x1   :  { %v18_v0 = vld [vmem:[%s522_s0] sm:$0xff]  ;;  %v19_v1 = vld [vmem:[%s522_s0 + $0x8] sm:$0xff]  ;;  %v34_v5 = vld [vmem:[%s523_s1 + $0x10] sm:$0xff] }
   0x2   :  { %v32_v2 = vld [vmem:[%s523_s1] sm:$0xff]  ;;  %v20_v3 = vmul.f32 %v18_v0, %v18_v0  ;;  %v33_v4 = vld [vmem:[%s523_s1 + $0x8] sm:$0xff]  ;;  %v35_v6 = vld [vmem:[%s523_s1 + $0x18] sm:$0xff]  ;;  %v21_v9 = vmul.f32 %v19_v1, %v19_v1 }
   0x3   :  { %v322_v7 = vpack.c.bf16 %v33_v4, %v32_v2  ;;  %v326_v8 = vpack.c.bf16 %v35_v6, %v34_v5  ;;  %v36_v10 = vld [vmem:[%s523_s1 + $0x20] sm:$0xff]  ;;  %v37_v11 = vld [vmem:[%s523_s1 + $0x28] sm:$0xff] }
   0x4   :  { %22 = vadd.xlane.f32.xlu0 %v20_v3 }
   0x5   :  { %7 = vsyncpa [#allocation3], 0  ;;  %323 = vmatprep.subr.bf16.mxu0 %v322_v7  ;;  %v330_v12 = vpack.c.bf16 %v37_v11, %v36_v10  ;;  %v38_v13 = vld [vmem:[%s523_s1 + $0x30] sm:$0xff]  ;;  %v39_v14 = vld [vmem:[%s523_s1 + $0x38] sm:$0xff]  ;;  %vm123_vm0 = vcmask 523264   ;;  %vm152_vm1 = vcmask 1048064  }
   0x6   :  { %325 = vmatpush3.bf16.msra.mxu0 %v322_v7  ;;  %v334_v15 = vpack.c.bf16 %v39_v14, %v38_v13  ;;  %v40_v16 = vld [vmem:[%s523_s1 + $0x40] sm:$0xff]  ;;  %v41_v17 = vld [vmem:[%s523_s1 + $0x48] sm:$0xff]  ;;  %v42_v19 = vld [vmem:[%s523_s1 + $0x50] sm:$0xff]  ;;  %vm16_vm2 = vcmask 0   ;;  %s413_s17 = smov [#allocation2]  }
   0x7   :  { %327 = vmatprep.subr.bf16.mxu0 %v326_v8  ;;  %v338_v18 = vpack.c.bf16 %v41_v17, %v40_v16  ;;  %v43_v20 = vld [vmem:[%s523_s1 + $0x58] sm:$0xff]  ;;  %v44_v22 = vld [vmem:[%s523_s1 + $0x60] sm:$0xff]  ;;  %v45_v23 = vld [vmem:[%s523_s1 + $0x68] sm:$0xff]  ;;  %s261_s18 = sshll.u32 %s413_s17, 4  ;;  %s262_s18 = int_to_ptr.vmem [resolvable:$true] %s261_s18 }
   0x8   :  { %24 = vadd.xlane.f32.xlu0 %v21_v9  ;;  %v342_v21 = vpack.c.bf16 %v43_v20, %v42_v19  ;;  %v46_v24 = vld [vmem:[%s523_s1 + $0x70] sm:$0xff]  ;;  %v346_v25 = vpack.c.bf16 %v45_v23, %v44_v22  ;;  %v47_v26 = vld [vmem:[%s523_s1 + $0x78] sm:$0xff]  ;;  %s411_s1 = smov 64   ;;  %s387_s19 = scalar_lea.vmem %s262_s18, 16 }
   0x9   :  { %v350_v27 = vpack.c.bf16 %v47_v26, %v46_v24  ;;  %p388_p0 = scmp.ne.s32.totalorder %s262_s18, %s387_s19  ;;  %s391_s20 = scalar_lea.vmem %s262_s18, 32 }
   0xa   :  { %329 = vmatpush3.bf16.msra.mxu0 %v326_v8  ;;  %p392_p1 = scmp.lt.s32.totalorder %s262_s18, %s262_s18  ;;  %p393_p2 = scmp.lt.s32.totalorder %s391_s20, %s387_s19 }
   0xb   :  { %331 = vmatprep.subr.bf16.mxu0 %v330_v12 }
   0xc   :  { %p394_p3 = por %p393_p2, %p392_p1 }
   0xe   :  { %333 = vmatpush3.bf16.msra.mxu0 %v330_v12  ;;  %p395_p4 = pnand %p394_p3, %p388_p0 }
   0xf   :  { %335 = vmatprep.subr.bf16.mxu0 %v334_v15 }
  0x12   :  { %337 = vmatpush3.bf16.msra.mxu0 %v334_v15 }
  0x13   :  { %339 = vmatprep.subr.bf16.mxu0 %v338_v18 }
  0x16   :  { %341 = vmatpush3.bf16.msra.mxu0 %v338_v18 }
  0x17   :  { %343 = vmatprep.subr.bf16.mxu0 %v342_v21 }
  0x1a   :  { %345 = vmatpush3.bf16.msra.mxu0 %v342_v21 }
  0x1b   :  { %347 = vmatprep.subr.bf16.mxu0 %v346_v25 }
  0x1e   :  { %349 = vmatpush3.bf16.msra.mxu0 %v346_v25 }
  0x1f   :  { %351 = vmatprep.subr.bf16.mxu0 %v350_v27 }
  0x22   :  { %353 = vmatpush3.bf16.msra.mxu0 %v350_v27 }
  0x91   :  { %v23_v28 = vpop.xlane.xlu0 %22 }
  0x92   :  { %v26_v29 = vmax.f32 %v23_v28, 1e-24 }
  0x94   :  { %359 = vrsqrt.f32 %v26_v29 }
  0x95   :  { %v25_v30 = vpop.xlane.xlu0 %24 }
  0x96   :  { %v27_v31 = vmax.f32 %v25_v30, 1e-24 }
  0x98   :  { %361 = vrsqrt.f32 %v27_v31 }
  0x9e   :  { %v360_v32 = vpop.eup %359 }
  0x9f   :  { %v30_v33 = vmul.f32 %v360_v32, %v18_v0 }
  0xa1   :  { %319 = vmatprep.mubr.f32.mxu0 %v30_v33 }
  0xa2   :  { %v362_v34 = vpop.eup %361 }
  0xa3   :  { %v31_v35 = vmul.f32 %v362_v34, %v19_v1 }
  0xa5   :  { %320 = vmatmul.mubr.f32.vlgmr.msra.gmra.mrb[0].mxu0 %v31_v35 }
 0x178   :  { %v321_v36 = vpop.f32.mrb[0].mxu0 }
 0x179   :  { %v114_v37 = vpop.f32.mrb[1].mxu0  ;;  %v127_v38 = vsel %vm123_vm0, %v321_v36, -inf  ;;  %v156_v41 = vsel %vm152_vm1, %v321_v36, -inf }
 0x17a   :  { %128 = vmax.xlane.f32.xlu1 %v127_v38  ;;  %v153_v39 = vsel %vm152_vm1, %v114_v37, -inf  ;;  %v124_v40 = vsel %vm123_vm0, %v114_v37, -inf }
 0x17b   :  { %154 = vmax.xlane.f32.xlu0 %v153_v39  ;;  %v412_v39 = vmov 0.0  }
 0x17c   :  { %17 = vst.msk [vmem:[#allocation2] sm:$0x1] %vm16_vm2, %v412_v39 }
 0x17e   :  { %125 = vmax.xlane.f32.xlu1 %v124_v40 }
 0x182   :  { %157 = vmax.xlane.f32.xlu1 %v156_v41 }
 0x207   :  { %v129_v42 = vpop.xlane.xlu1 %128 }
 0x208   :  { %v155_v43 = vpop.xlane.xlu0 %154  ;;  %v131_v52 = vsub.f32 %v321_v36, %v129_v42 }
 0x209   :  { %v485_v44 = vsub.f32 %v114_v37, %v155_v43 }
 0x20a   :  { %v134_v53 = vmul.f32 1.442695, %v131_v52 }
 0x20b   :  { %v161_v45 = vmul.f32 1.442695, %v485_v44  ;;  %v126_v46 = vpop.xlane.xlu1 %125 }
 0x20c   :  { %v130_v54 = vsub.f32 %v114_v37, %v126_v46 }
 0x20d   :  { %363 = vpow2.f32 %v161_v45 }
 0x20e   :  { %v132_v55 = vmul.f32 1.442695, %v130_v54 }
 0x20f   :  { %v158_v47 = vpop.xlane.xlu1 %157 }
 0x210   :  { %v488_v48 = vsub.f32 %v321_v36, %v158_v47  ;;  %v222_v47 = vld [vmem:[#allocation2] sm:$0x1] }
 0x212   :  { %v163_v49 = vmul.f32 1.442695, %v488_v48 }
 0x214   :  { %365 = vpow2.f32 %v163_v49 }
 0x215   :  { %367 = vpow2.f32 %v134_v53 }
 0x216   :  { %369 = vpow2.f32 %v132_v55 }
 0x217   :  { %v364_v50 = vpop.eup %363 }
 0x218   :  { %167 = vrot.lane.b32.xlu0 %v364_v50, %s411_s1 }
 0x21e   :  { %v366_v51 = vpop.eup %365 }
 0x21f   :  { %169 = vrot.lane.b32.xlu1 %v366_v51, %s411_s1  ;;  %v368_v56 = vpop.eup %367 }
 0x220   :  { %v139_v57 = vsel %vm123_vm0, %v368_v56, 0.0  ;;  %v370_v58 = vpop.eup %369 }
 0x221   :  { %v136_v59 = vsel %vm123_vm0, %v370_v58, 0.0 }
 0x237   :  { %140 = vadd.xlane.f32.xlu0 %v139_v57 }
 0x243   :  { %137 = vadd.xlane.f32.xlu1 %v136_v59 }
 0x28a   :  { %v168_v60 = vpop.permute.xlu0 %167 }
 0x28b   :  { %v173_v61 = vsel %vm123_vm0, %v168_v60, 0.0 }
 0x28c   :  { %174 = vadd.xlane.f32.xlu0 %v173_v61 }
 0x291   :  { %v170_v62 = vpop.permute.xlu1 %169 }
 0x292   :  { %v176_v63 = vsel %vm123_vm0, %v170_v62, 0.0 }
 0x293   :  { %177 = vadd.xlane.f32.xlu1 %v176_v63 }
 0x2c4   :  { %v141_v0 = vpop.xlane.xlu0 %140 }
 0x2c5   :  { %371 = vrcp.f32 %v141_v0 }
 0x2c6   :  { %373 = vlog2.f32 %v141_v0 }
 0x2cf   :  { %v372_v1 = vpop.eup %371 }
 0x2d0   :  { %v138_v2 = vpop.xlane.xlu1 %137  ;;  %v151_v3 = vmul.f32 %v372_v1, %v368_v56  ;;  %v374_v4 = vpop.eup %373 }
 0x2d1   :  { %375 = vlog2.f32 %v138_v2  ;;  %v145_v9 = vmul.f32 0.6931472, %v374_v4 }
 0x2d2   :  { %377 = vrcp.f32 %v138_v2  ;;  %193 = vrot.lane.b32.xlu1 %v151_v3, %s411_s1 }
 0x2d3   :  { %v147_v11 = vsub.f32 %v131_v52, %v145_v9 }
 0x2db   :  { %v376_v5 = vpop.eup %375 }
 0x2dc   :  { %v378_v6 = vpop.eup %377  ;;  %v143_v7 = vmul.f32 0.6931472, %v376_v5 }
 0x2dd   :  { %v149_v8 = vmul.f32 %v378_v6, %v370_v58 }
 0x2de   :  { %v146_v10 = vsub.f32 %v130_v54, %v143_v7 }
 0x2df   :  { %191 = vrot.lane.b32.xlu0 %v149_v8, %s411_s1 }
 0x2e0   :  { %201 = vrot.lane.b32.xlu1 %v146_v10, %s411_s1 }
 0x2e4   :  { %203 = vrot.lane.b32.xlu1 %v147_v11, %s411_s1 }
 0x319   :  { %v175_v12 = vpop.xlane.xlu0 %174 }
 0x31a   :  { %379 = vlog2.f32 %v175_v12 }
 0x31b   :  { %381 = vrcp.f32 %v175_v12 }
 0x320   :  { %v178_v13 = vpop.xlane.xlu1 %177 }
 0x321   :  { %383 = vlog2.f32 %v178_v13 }
 0x322   :  { %385 = vrcp.f32 %v178_v13 }
 0x324   :  { %v380_v14 = vpop.eup %379 }
 0x325   :  { %v382_v15 = vpop.eup %381  ;;  %v180_v16 = vmul.f32 0.6931472, %v380_v14 }
 0x326   :  { %v186_v19 = vmul.f32 %v382_v15, %v364_v50 }
 0x327   :  { %v183_v21 = vsub.f32 %v485_v44, %v180_v16 }
 0x32b   :  { %v384_v17 = vpop.eup %383 }
 0x32c   :  { %v182_v22 = vmul.f32 0.6931472, %v384_v17  ;;  %v386_v23 = vpop.eup %385 }
 0x32d   :  { %v188_v27 = vmul.f32 %v386_v23, %v366_v51 }
 0x32e   :  { %v184_v29 = vsub.f32 %v488_v48, %v182_v22 }
 0x344   :  { %v194_v18 = vpop.permute.xlu1 %193 }
 0x345   :  { %v198_v31 = vsub.f32 %v188_v27, %v194_v18 }
 0x351   :  { %v192_v20 = vpop.permute.xlu0 %191 }
 0x352   :  { %v202_v24 = vpop.permute.xlu1 %201  ;;  %v197_v25 = vsub.f32 %v186_v19, %v192_v20 }
 0x353   :  { %v207_v26 = vsub.f32 %v183_v21, %v202_v24 }
 0x355   :  { %v209_v28 = vmul.f32 %v207_v26, %v197_v25 }
 0x356   :  { %v204_v30 = vpop.permute.xlu1 %203 }
 0x357   :  { %v208_v32 = vsub.f32 %v184_v29, %v204_v30  ;;  %225 = vrot.lane.b32.xlu0 %v209_v28, %s411_s1 }
 0x359   :  { %v210_v33 = vmul.f32 %v208_v32, %v198_v31 }
 0x35b   :  { %227 = vrot.lane.b32.xlu1 %v210_v33, %s411_s1 }
 0x3c9   :  { %v226_v34 = vpop.permute.xlu0 %225 }
 0x3ca   :  { %v231_v36 = vsel %vm123_vm0, %v226_v34, 0.0 }
 0x3cd   :  { %v228_v35 = vpop.permute.xlu1 %227 }
 0x3ce   :  { %v232_v37 = vsel %vm123_vm0, %v228_v35, 0.0 }
 0x3cf   :  { %v233_v38 = vadd.f32 %v232_v37, %v231_v36 }
 0x3d1   :  { %234 = vadd.xlane.f32.xlu0 %v233_v38 }
 0x45e   :  { %v235_v40 = vpop.xlane.xlu0 %234 }
 0x45f   :  { %v236_v41 = vrot.slane %v235_v40, 4 }
 0x461   :  { %v237_v42 = vadd.f32 %v236_v41, %v235_v40 }
 0x463   :  { %v238_v43 = vrot.slane %v237_v42, 2 }
 0x465   :  { %v239_v44 = vadd.f32 %v238_v43, %v237_v42 }
 0x467   :  { %v240_v45 = vrot.slane %v239_v44, 1 }
 0x469   :  { %v241_v46 = vadd.f32 %v240_v45, %v239_v44 }
 0x46b   :  { %354 = vpush %v241_v46 }
 0x49c   :  { %s355_s16 = spop %354 }
 0x49d   :  { %v243_v48 = vstv %s355_s16 }
 0x49e   :  { %v244_v49 = vmul.f32 0.5, %v243_v48 }
 0x4a0   :  { %v245_v50 = vadd.f32 %v244_v49, %v222_v47 }
 0x4a2   :  { %247 = vst.msk [vmem:[#allocation2] sm:$0x1] %vm16_vm2, %v245_v50 }
 0x4a9   :  { %v251_v51 = vld [vmem:[#allocation2] sm:$0x1] }
 0x4aa   :  { %v253_v52 = vmul.f32 0.0625, %v251_v51 }
 0x4ac   :  { %254 = vst.msk [vmem:[#allocation2] sm:$0x1] %vm16_vm2, %v253_v52 }
 0x4ad   :  { %398 = shalt.err (!%p395_p4)
}
 0x4ae   :  { %s399_s22 = scalar_lea.hbm %s524_s2, 16 }
 0x4af   :  { %p400_p5 = scmp.ne.s32.totalorder %s524_s2, %s399_s22  ;;  %p403_p6 = scmp.lt.u32.totalorder %s399_s22, %s524_s2 }
 0x4b1   :  { %p405_p7 = pnand %p403_p6, %p400_p5 }
 0x4b3   :  { %408 = shalt.err (!%p405_p7)
}
 0x4b4   :  { %264 = dma.vmem_to_hbm [thread:$0]  %s262_s18, 16, %s524_s2, [#allocation3]  }
 0x4b5   :  { %409 = dma.done.wait [#allocation3], 16  }
 0x4b6   :  { %410 = vsyncadd [#allocation3], 4294967280 }
 0x4b7   :  { %268 = vsyncpa [#allocation3], 1 }

</bundles_post_ra>
